<compile_context>
chip_gen: v5e
topology: v5e:2x2
jax: 0.10.0
libtpu: 0.0.40
codegen_flags: <defaults>
</compile_context>

<pallas_src>
import functools

import jax
import jax.numpy as jnp
from jax.experimental import pallas as pl
from jax.experimental.pallas import tpu as pltpu

_LANE = 128
_SUBLANE = 8
# 8192 rows x 128 lanes x 4 B = 4 MiB per (f32) input block.
_TARGET_TILE_ROWS = 8192


def _accumulate(o_ref, d, tile_rows):
    """Fold squared diffs of one (tile_rows, 128) tile onto the (8,128) slab."""
    sq = d * d
    # Plain vector adds onto 8 sublanes (VPU only, no per-step cross-lane
    # reduce); the single final reduce happens in the wrapper.
    o_ref[...] += sq.reshape(tile_rows // _SUBLANE, _SUBLANE, _LANE).sum(axis=0)


def _mse_sum_kernel(x_ref, y_ref, o_ref, *, tile_rows, total_rows,
                    blocks_per_part, num_blocks, need_mask):
    """Accumulate sum((x-y)^2) of one block into the revisited (8,128) slab."""
    p = pl.program_id(0)   # part (2-TC split on v7x, size 1 elsewhere)
    j = pl.program_id(1)   # reduction step within the part

    @pl.when(j == 0)
    def _():
        o_ref[...] = jnp.zeros_like(o_ref)

    d = x_ref[...].astype(jnp.float32) - y_ref[...].astype(jnp.float32)

    if need_mask:
        b = p * blocks_per_part + j          # unclamped block index
        is_edge = b >= num_blocks - 1        # ragged last block or clamped dup

        # Interior blocks: no masking work at all (keeps the kernel DMA-bound).
        @pl.when(jnp.logical_not(is_edge))
        def _():
            _accumulate(o_ref, d, tile_rows)

        # Edge / clamped-duplicate blocks: rows past the end of the array were
        # never DMA'd (stale VMEM) -> zero them before squaring.  Clamped
        # duplicates use the unclamped base, so every row masks to zero.
        @pl.when(is_edge)
        def _():
            base = b * tile_rows
            row_ids = base + jax.lax.broadcasted_iota(jnp.int32, d.shape, 0)
            _accumulate(o_ref, jnp.where(row_ids < total_rows, d, 0.0),
                        tile_rows)
    else:
        _accumulate(o_ref, d, tile_rows)


def _num_tensorcores_per_chip():
    # TODO(synk): on v7x, verify with xprof / bundle dump that the leading
    # "parallel" grid axis really shards across both TensorCores; if it
    # lowers as a serial loop, switch to pltpu.CORE_PARALLEL / pl.core_map.
    try:
        kind = jax.devices()[0].device_kind.lower()
    except Exception:
        return 1
    return 2 if "v7" in kind else 1


def _sq_diff_sum(x2, y2):
    """Sum of squared differences over a (rows, 128) pair via Pallas."""
    rows = x2.shape[0]
    # tile_rows is always a multiple of 8: the caller 8-aligns rows when
    # rows <= _TARGET_TILE_ROWS; otherwise tile_rows == _TARGET_TILE_ROWS.
    tile_rows = min(rows, _TARGET_TILE_ROWS)
    num_blocks = pl.cdiv(rows, tile_rows)

    # 2-way split only where there are 2 TensorCores (v7x); on single-TC
    # chips it would just add a clamped duplicate-block DMA + extra flush.
    parts = 2 if (num_blocks >= 2 and _num_tensorcores_per_chip() >= 2) else 1
    blocks_per_part = pl.cdiv(num_blocks, parts)
    covered_rows = parts * blocks_per_part * tile_rows
    need_mask = covered_rows != rows
    clamp_blocks = parts * blocks_per_part != num_blocks
    last_block = num_blocks - 1

    def in_map(p, j):
        b = p * blocks_per_part + j
        if clamp_blocks:
            b = jnp.minimum(b, last_block)   # never issue a fully-OOB DMA
        return (b, 0)

    kernel = functools.partial(
        _mse_sum_kernel,
        tile_rows=tile_rows,
        total_rows=rows,
        blocks_per_part=blocks_per_part,
        num_blocks=num_blocks,
        need_mask=need_mask,
    )

    # Explicit VMEM budget: 2 double-buffered input blocks + f32 intermediates
    # + slack.  Keeps the 8192-row tile portable (v5e's 16 MiB default scoped
    # limit, v7x's 64 MiB physical VMEM).
    in_block_bytes = tile_rows * _LANE * (x2.dtype.itemsize + y2.dtype.itemsize)
    f32_block_bytes = tile_rows * _LANE * 4
    vmem_limit = max(2 * in_block_bytes + 4 * f32_block_bytes + (2 << 20),
                     16 << 20)

    n_elems = rows * _LANE
    cost = pl.CostEstimate(
        flops=3 * n_elems,
        transcendentals=0,
        bytes_accessed=(rows * _LANE
                        * (x2.dtype.itemsize + y2.dtype.itemsize)
                        + parts * _SUBLANE * _LANE * 4),
    )

    partials = pl.pallas_call(
        kernel,
        out_shape=jax.ShapeDtypeStruct((parts, _SUBLANE, _LANE), jnp.float32),
        grid_spec=pltpu.PrefetchScalarGridSpec(
            num_scalar_prefetch=0,
            grid=(parts, blocks_per_part),
            in_specs=[
                pl.BlockSpec((tile_rows, _LANE), in_map),
                pl.BlockSpec((tile_rows, _LANE), in_map),
            ],
            out_specs=pl.BlockSpec((None, _SUBLANE, _LANE),
                                   lambda p, j: (p, 0, 0)),
        ),
        compiler_params=pltpu.CompilerParams(
            dimension_semantics=("parallel", "arbitrary"),
            vmem_limit_bytes=int(vmem_limit),
        ),
        cost_estimate=cost,
    )(x2, y2)

    return jnp.sum(partials)


def generator_loss(out_labels, out_images, target_images):
    """Matches GeneratorLoss.forward: returns MSE(out_images, target_images)."""
    del out_labels  # unused by the reference module's forward
    assert out_images.shape == target_images.shape

    n_total = out_images.size
    x = out_images.reshape(-1)       # free view for contiguous input, no cast
    y = target_images.reshape(-1)

    rows = n_total // _LANE
    if rows > _TARGET_TILE_ROWS:
        kernel_rows = rows                            # ragged last block masked in-kernel
    else:
        kernel_rows = (rows // _SUBLANE) * _SUBLANE   # keep the single block 8-aligned
    bulk = kernel_rows * _LANE

    total = jnp.float32(0.0)
    if kernel_rows > 0:
        # When n_total is a multiple of 128*8 (the common case for image
        # tensors) this is a zero-copy reshape of the original HBM buffer.
        # TODO(synk): for non-128-multiple n_total the prefix slice feeding
        # pallas_call may materialize an HBM copy; handling the partial final
        # lane-row in-kernel would need a manual-DMA (pl.ANY) path.
        x2 = x[:bulk].reshape(kernel_rows, _LANE)
        y2 = y[:bulk].reshape(kernel_rows, _LANE)
        total = total + _sq_diff_sum(x2, y2)
    if bulk < n_total:
        # Tiny ragged tail (< 1024 elements): plain JAX.
        dt = x[bulk:].astype(jnp.float32) - y[bulk:].astype(jnp.float32)
        total = total + jnp.sum(dt * dt)

    return total / jnp.float32(n_total)


if __name__ == "__main__":
    key = jax.random.PRNGKey(0)
    k1, k2, k3 = jax.random.split(key, 3)

    # Shapes consistent with an SRGAN-style generator loss:
    #   out_labels: discriminator outputs (unused), out/target images NCHW.
    out_labels = jax.random.uniform(k1, (2, 1), dtype=jnp.float32)
    out_images = jax.random.normal(k2, (2, 4, 16, 16), dtype=jnp.float32)
    target_images = jax.random.normal(k3, (2, 4, 16, 16), dtype=jnp.float32)

    loss_fn = jax.jit(generator_loss)
    loss = loss_fn(out_labels, out_images, target_images)
    loss = jax.block_until_ready(loss)

    # sanity check vs pure-JAX reference
    ref = jnp.mean((out_images - target_images) ** 2)
    assert jnp.allclose(loss, ref, rtol=1e-5, atol=1e-6), (loss, ref)

    print("KERNEL_OK")
</pallas_src>

<mosaic_0001>
module attributes {stable_mosaic.version = 11 : i64} {
  func.func @_mse_sum_kernel(%arg0: i32, %arg1: i32, %arg2: memref<16x128xf32, #tpu.memory_space<vmem>>, %arg3: memref<16x128xf32, #tpu.memory_space<vmem>>, %arg4: memref<1x8x128xf32, #tpu.memory_space<vmem>>) attributes {dimension_semantics = [#tpu.dimension_semantics<parallel>, #tpu.dimension_semantics<arbitrary>], iteration_bounds = array<i64: 1, 1>, scalar_prefetch = 0 : i64, scratch_operands = 0 : i64, tpu.core_type = #tpu.core_type<tc>, window_params = [{transform_indices = @transform_0, window_bounds = array<i64: 16, 128>}, {transform_indices = @transform_1, window_bounds = array<i64: 16, 128>}, {transform_indices = @transform_2, window_bounds = array<i64: 1, 8, 128>}]} {
    %c0_i32 = arith.constant 0 : i32
    %0 = arith.cmpi eq, %arg1, %c0_i32 : i32
    %1 = arith.extui %0 : i1 to i32
    %c0_i32_0 = arith.constant 0 : i32
    %2 = arith.cmpi ne, %1, %c0_i32_0 : i32
    scf.if %2 {
      %cst_10 = arith.constant 0.000000e+00 : f32
      %15 = vector.broadcast %cst_10 : f32 to vector<8x128xf32>
      %c0_11 = arith.constant 0 : index
      %c0_12 = arith.constant 0 : index
      %c0_13 = arith.constant 0 : index
      %16 = vector.load %arg4[%c0_11, %c0_12, %c0_13] : memref<1x8x128xf32, #tpu.memory_space<vmem>>, vector<1x8x128xf32>
      %17 = vector.shape_cast %16 : vector<1x8x128xf32> to vector<8x128xf32>
      %18 = vector.shape_cast %15 : vector<8x128xf32> to vector<1x8x128xf32>
      tpu.vector_store %arg4[%c0_11, %c0_12, %c0_13], %18 {strides = array<i32>} : memref<1x8x128xf32, #tpu.memory_space<vmem>>, vector<1x8x128xf32>,
    } else {
    }
    %c0 = arith.constant 0 : index
    %c0_1 = arith.constant 0 : index
    %3 = vector.load %arg2[%c0, %c0_1] : memref<16x128xf32, #tpu.memory_space<vmem>>, vector<16x128xf32>
    %c0_2 = arith.constant 0 : index
    %c0_3 = arith.constant 0 : index
    %4 = vector.load %arg3[%c0_2, %c0_3] : memref<16x128xf32, #tpu.memory_space<vmem>>, vector<16x128xf32>
    %5 = arith.subf %3, %4 : vector<16x128xf32>
    %6 = arith.mulf %5, %5 : vector<16x128xf32>
    %c0_4 = arith.constant 0 : index
    %c0_5 = arith.constant 0 : index
    %c0_6 = arith.constant 0 : index
    %7 = vector.load %arg4[%c0_4, %c0_5, %c0_6] : memref<1x8x128xf32, #tpu.memory_space<vmem>>, vector<1x8x128xf32>
    %8 = vector.shape_cast %7 : vector<1x8x128xf32> to vector<8x128xf32>
    %9 = vector.shape_cast %6 : vector<16x128xf32> to vector<2x8x128xf32>
    %cst = arith.constant dense<0.000000e+00> : vector<8x128xf32>
    %10 = vector.multi_reduction <add>, %9, %cst [0] : vector<2x8x128xf32> to vector<8x128xf32>
    %11 = arith.addf %8, %10 : vector<8x128xf32>
    %c0_7 = arith.constant 0 : index
    %c0_8 = arith.constant 0 : index
    %c0_9 = arith.constant 0 : index
    %12 = vector.load %arg4[%c0_7, %c0_8, %c0_9] : memref<1x8x128xf32, #tpu.memory_space<vmem>>, vector<1x8x128xf32>
    %13 = vector.shape_cast %12 : vector<1x8x128xf32> to vector<8x128xf32>
    %14 = vector.shape_cast %11 : vector<8x128xf32> to vector<1x8x128xf32>
    tpu.vector_store %arg4[%c0_7, %c0_8, %c0_9], %14 {strides = array<i32>} : memref<1x8x128xf32, #tpu.memory_space<vmem>>, vector<1x8x128xf32>,
    return
  }
  func.func @transform_0(%arg0: i32, %arg1: i32) -> (i32, i32) {
    %c1_i32 = arith.constant 1 : i32
    %0 = arith.muli %arg0, %c1_i32 : i32
    %1 = arith.addi %0, %arg1 : i32
    %c0_i32 = arith.constant 0 : i32
    %c0_i32_0 = arith.constant 0 : i32
    return %1, %c0_i32 : i32, i32
  }
  func.func @transform_1(%arg0: i32, %arg1: i32) -> (i32, i32) {
    %c1_i32 = arith.constant 1 : i32
    %0 = arith.muli %arg0, %c1_i32 : i32
    %1 = arith.addi %0, %arg1 : i32
    %c0_i32 = arith.constant 0 : i32
    %c0_i32_0 = arith.constant 0 : i32
    return %1, %c0_i32 : i32, i32
  }
  func.func @transform_2(%arg0: i32, %arg1: i32) -> (i32, i32, i32) {
    %c0_i32 = arith.constant 0 : i32
    %c0_i32_0 = arith.constant 0 : i32
    %c0_i32_1 = arith.constant 0 : i32
    return %arg0, %c0_i32, %c0_i32_0 : i32, i32, i32
  }
}

</mosaic_0001>

<bundles_post_ra>
// kernel: generator_loss.1
= control target key start
LH: loop header
LB: loop body
LE: loop exit
PB: predicated region body
PF: predicated region fallthrough
CT: control target
= control target key end

     0   :  { %s119_s0 = inlined_call_operand.vmem [shape: f32[16,128], index: 0, kind: input, shape index: {}]   ;;  %s120_s1 = inlined_call_operand.vmem [shape: f32[16,128], index: 1, kind: input, shape index: {}]   ;;  %s121_s2 = inlined_call_operand.vmem [shape: f32[1,8,128], index: 2, kind: output, shape index: {}]  }
   0x1   :  { %v60_v0 = vld [vmem:[%s119_s0] sm:$0xff]  ;;  %v61_v1 = vld [vmem:[%s119_s0 + $0x8] sm:$0xff] }
   0x2   :  { %v62_v2 = vld [vmem:[%s120_s1] sm:$0xff]  ;;  %v63_v3 = vld [vmem:[%s120_s1 + $0x8] sm:$0xff] }
   0x3   :  { %v64_v4 = vsub.f32 %v60_v0, %v62_v2  ;;  %v65_v5 = vsub.f32 %v61_v1, %v63_v3 }
   0x5   :  { %v66_v6 = vmul.f32 %v64_v4, %v64_v4  ;;  %v67_v7 = vmul.f32 %v65_v5, %v65_v5 }
   0x7   :  { %v69_v8 = vadd.f32 %v67_v7, %v66_v6 }
   0x9   :  { %71 = vst [vmem:[%s121_s2] sm:$0xff] %v69_v8 }

</bundles_post_ra>
